<compile_context>
chip_gen: v7x
topology: tpu7x:2x2x1
jax: 0.10.0
libtpu: 0.0.40
codegen_flags: <defaults>
</compile_context>

<pallas_src>
import jax
import jax.numpy as jnp
from jax import lax
from jax.experimental import pallas as pl
from jax.experimental.pallas import tpu as pltpu


def _pooler_start_logits_kernel(x_ref, w_ref, b_ref, o_ref):
    # x_ref: (TM, H)  w_ref: (L, H)  b_ref: (1, L)  o_ref: (TM, L)
    acc = lax.dot_general(
        x_ref[...], w_ref[...],
        dimension_numbers=(((1,), (1,)), ((), ())),   # x @ W^T on the MXU
        preferred_element_type=jnp.float32,
    )
    o_ref[...] = (acc + b_ref[...].astype(jnp.float32)).astype(o_ref.dtype)


def _sublane_multiple(dtype):
    """Second-to-last-dim granularity: 8 for 32-bit, 16 for bf16, 32 for 8-bit."""
    bits = jnp.dtype(dtype).itemsize * 8
    return max(8, 256 // bits)


def _generation_budget():
    """Per-generation (x-tile budget bytes, row cap, vmem_limit_bytes or None)."""
    try:
        kind = jax.devices()[0].device_kind.lower()
    except Exception:
        kind = ""
    if "v7" in kind:
        # 64 MiB physical VMEM (32 MiB default scoped) per TensorCore: stay modest.
        return 8 * 1024 * 1024, 4096, None
    if "v6" in kind:
        # 128 MiB physical VMEM, ~1.4 TB/s HBM: bigger tiles, raise scoped limit.
        return 14 * 1024 * 1024, 8192, 64 << 20
    if "v5" in kind:
        # v5e: 16 MiB default scoped VMEM -> smaller tiles + explicit limit raise.
        return 6 * 1024 * 1024, 4096, 64 << 20
    # Unknown generation: conservative defaults.
    return 6 * 1024 * 1024, 2048, None


def _pick_tm(M, H, dtype, budget_bytes, row_cap):
    sub = _sublane_multiple(dtype)
    itemsize = jnp.dtype(dtype).itemsize
    tm = budget_bytes // max(1, H * itemsize)
    tm = min(int(tm), int(row_cap))
    # Never collapse to grid=(1,) when M is big enough for >= ~8 tiles: keeps
    # the DMA/compute pipeline busy and both v7x TensorCores fed.
    min_steps = 8
    if M >= min_steps * sub:
        tm = min(tm, pl.cdiv(M, min_steps))
    tm = max(sub, (tm // sub) * sub)
    if tm >= M:
        return M            # full-extent block is always a legal block shape
    return tm


def pooler_start_logits(hidden_states, weight, bias, p_mask=None, tm=None):
    """hidden_states: (B, S, H); weight: (L, H) [nn.Linear layout]; bias: (L,)."""
    del p_mask  # the reference forward ignores p_mask entirely
    B, S, H = hidden_states.shape
    L = weight.shape[0]
    M = B * S

    x2d = hidden_states.reshape(M, H)
    w2d = jnp.asarray(weight)             # (L, H): keep lane-dense, no transpose
    b2d = jnp.asarray(bias).reshape(1, L)

    budget, row_cap, vmem_limit = _generation_budget()
    sub = _sublane_multiple(hidden_states.dtype)
    if tm is None:
        TM = _pick_tm(M, H, hidden_states.dtype, budget, row_cap)
    else:
        TM = M if tm >= M else max(sub, (int(tm) // sub) * sub)

    grid = (pl.cdiv(M, TM),)

    itemsize = jnp.dtype(hidden_states.dtype).itemsize
    cost = pl.CostEstimate(
        flops=2 * M * H * L,
        transcendentals=0,
        bytes_accessed=(M * H * itemsize
                        + L * H * jnp.dtype(w2d.dtype).itemsize
                        + M * L * itemsize),
    )

    compiler_kwargs = dict(dimension_semantics=("parallel",))
    if vmem_limit is not None:
        compiler_kwargs["vmem_limit_bytes"] = vmem_limit

    out = pl.pallas_call(
        _pooler_start_logits_kernel,
        out_shape=jax.ShapeDtypeStruct((M, L), hidden_states.dtype),
        grid_spec=pltpu.PrefetchScalarGridSpec(
            num_scalar_prefetch=0,
            grid=grid,
            in_specs=[
                # Stream x tiles along M.
                pl.BlockSpec((TM, H), lambda i: (i, 0)),
                # Weight / bias are grid-invariant: resident, single-buffered.
                pl.BlockSpec((L, H), lambda i: (0, 0),
                             pipeline_mode=pl.Buffered(1)),
                pl.BlockSpec((1, L), lambda i: (0, 0),
                             pipeline_mode=pl.Buffered(1)),
            ],
            out_specs=pl.BlockSpec((TM, L), lambda i: (i, 0)),
        ),
        compiler_params=pltpu.CompilerParams(**compiler_kwargs),
        cost_estimate=cost,
    )(x2d, w2d, b2d)
    return out.reshape(B, S, L)


if __name__ == "__main__":
    key = jax.random.PRNGKey(0)
    k_x, k_w, k_b, k_x2, k_x3 = jax.random.split(key, 5)

    # --- Test 1: small shapes consistent with the module ---------------------
    B, S, H, L = 2, 8, 32, 4
    hidden_states = jax.random.normal(k_x, (B, S, H), dtype=jnp.float32)
    weight = jax.random.normal(k_w, (L, H), dtype=jnp.float32) * 0.02
    bias = jax.random.normal(k_b, (L,), dtype=jnp.float32) * 0.02

    out = pooler_start_logits(hidden_states, weight, bias)
    out = jax.block_until_ready(out)
    ref = hidden_states @ weight.T + bias
    assert out.shape == (B, S, L)
    assert jnp.allclose(out, ref, atol=1e-5, rtol=1e-5)

    # --- Test 2: explicit small TM -> M tiling with a partial last block -----
    B2, S2, H2 = 2, 20, 128                  # M = 40, TM = 16 -> 3 blocks
    hs2 = jax.random.normal(k_x2, (B2, S2, H2), dtype=jnp.float32)
    w2 = jax.random.normal(k_w, (L, H2), dtype=jnp.float32) * 0.02
    b2 = jax.random.normal(k_b, (L,), dtype=jnp.float32) * 0.02

    out2 = pooler_start_logits(hs2, w2, b2, tm=16)
    out2 = jax.block_until_ready(out2)
    ref2 = hs2 @ w2.T + b2
    assert out2.shape == (B2, S2, L)
    assert jnp.allclose(out2, ref2, atol=1e-5, rtol=1e-5)

    # --- Test 3: auto TM path with enough rows to force a multi-step grid ----
    B3, S3, H3 = 2, 512, 64                  # M = 1024 -> >= 8 grid steps
    hs3 = jax.random.normal(k_x3, (B3, S3, H3), dtype=jnp.float32)
    w3 = jax.random.normal(k_w, (L, H3), dtype=jnp.float32) * 0.02
    b3 = jax.random.normal(k_b, (L,), dtype=jnp.float32) * 0.02

    out3 = pooler_start_logits(hs3, w3, b3)
    out3 = jax.block_until_ready(out3)
    ref3 = hs3 @ w3.T + b3
    assert out3.shape == (B3, S3, L)
    assert jnp.allclose(out3, ref3, atol=1e-4, rtol=1e-4)

    print("KERNEL_OK")
</pallas_src>

<mosaic_0001>
module attributes {stable_mosaic.version = 11 : i64} {
  func.func @_pooler_start_logits_kernel(%arg0: i32, %arg1: memref<16x32xf32, #tpu.memory_space<vmem>>, %arg2: memref<4x32xf32, #tpu.memory_space<vmem>>, %arg3: memref<1x4xf32, #tpu.memory_space<vmem>>, %arg4: memref<16x4xf32, #tpu.memory_space<vmem>>) attributes {dimension_semantics = [#tpu.dimension_semantics<parallel>], iteration_bounds = array<i64: 1>, scalar_prefetch = 0 : i64, scratch_operands = 0 : i64, tpu.core_type = #tpu.core_type<tc>, window_params = [{transform_indices = @transform_0, window_bounds = array<i64: 16, 32>}, {pipeline_mode = #tpu.pipeline_mode<synchronous>, transform_indices = @transform_1, window_bounds = array<i64: 4, 32>}, {pipeline_mode = #tpu.pipeline_mode<synchronous>, transform_indices = @transform_2, window_bounds = array<i64: 1, 4>}, {transform_indices = @transform_3, window_bounds = array<i64: 16, 4>}]} {
    %c0 = arith.constant 0 : index
    %c0_0 = arith.constant 0 : index
    %0 = vector.load %arg1[%c0, %c0_0] : memref<16x32xf32, #tpu.memory_space<vmem>>, vector<16x32xf32>
    %c0_1 = arith.constant 0 : index
    %c0_2 = arith.constant 0 : index
    %1 = vector.load %arg2[%c0_1, %c0_2] : memref<4x32xf32, #tpu.memory_space<vmem>>, vector<4x32xf32>
    %cst = arith.constant dense<0.000000e+00> : vector<16x4xf32>
    %2 = tpu.matmul %0, %1, %cst {dimension_numbers = #tpu.dot_dimension_numbers<[1], [1], [0], [0], [0, 0, 1, 0], [], []>} : vector<16x32xf32>, vector<4x32xf32>, vector<16x4xf32> -> vector<16x4xf32>
    %c0_3 = arith.constant 0 : index
    %c0_4 = arith.constant 0 : index
    %3 = vector.load %arg3[%c0_3, %c0_4] : memref<1x4xf32, #tpu.memory_space<vmem>>, vector<1x4xf32>
    %4 = vector.broadcast %3 : vector<1x4xf32> to vector<16x4xf32>
    %5 = arith.addf %2, %4 : vector<16x4xf32>
    %c0_5 = arith.constant 0 : index
    %c0_6 = arith.constant 0 : index
    %6 = vector.load %arg4[%c0_5, %c0_6] : memref<16x4xf32, #tpu.memory_space<vmem>>, vector<16x4xf32>
    tpu.vector_store %arg4[%c0_5, %c0_6], %5 {strides = array<i32>} : memref<16x4xf32, #tpu.memory_space<vmem>>, vector<16x4xf32>,
    return
  }
  func.func @transform_0(%arg0: i32) -> (i32, i32) {
    %c0_i32 = arith.constant 0 : i32
    %c0_i32_0 = arith.constant 0 : i32
    return %arg0, %c0_i32 : i32, i32
  }
  func.func @transform_1(%arg0: i32) -> (i32, i32) {
    %c0_i32 = arith.constant 0 : i32
    %c0_i32_0 = arith.constant 0 : i32
    %c0_i32_1 = arith.constant 0 : i32
    return %c0_i32, %c0_i32_0 : i32, i32
  }
  func.func @transform_2(%arg0: i32) -> (i32, i32) {
    %c0_i32 = arith.constant 0 : i32
    %c0_i32_0 = arith.constant 0 : i32
    %c0_i32_1 = arith.constant 0 : i32
    return %c0_i32, %c0_i32_0 : i32, i32
  }
  func.func @transform_3(%arg0: i32) -> (i32, i32) {
    %c0_i32 = arith.constant 0 : i32
    %c0_i32_0 = arith.constant 0 : i32
    return %arg0, %c0_i32 : i32, i32
  }
}

</mosaic_0001>

<bundles_post_ra>
// kernel: tpu_custom_call.1
= control target key start
LH: loop header
LB: loop body
LE: loop exit
PB: predicated region body
PF: predicated region fallthrough
CT: control target
= control target key end

     0   :  { %8 = vsyncpa [#allocation3], 0  ;;  %s265_s0 = inlined_call_operand.hbm [shape: f32[16,32], index: 0, kind: input, shape index: {}]   ;;  %s266_s1 = inlined_call_operand.hbm [shape: f32[4,32], index: 1, kind: input, shape index: {}]   ;;  %s267_s2 = inlined_call_operand.vmem [shape: f32[1,4], index: 2, kind: input, shape index: {}]   ;;  %s268_s3 = inlined_call_operand.vmem [shape: f32[16,4], index: 3, kind: output, shape index: {}]  }
   0x1   :  { %9 = vsyncpa [#allocation5], 0  ;;  %s208_s12 = smov [#allocation2]   ;;  %s160_s16 = scalar_lea.hbm %s265_s0, 256 }
   0x2   :  { %s15_s13 = sshll.u32 %s208_s12, 4  ;;  %p161_p0 = scmp.ne.s32.totalorder %s265_s0, %s160_s16  ;;  %s16_s13 = int_to_ptr.vmem [resolvable:$true] %s15_s13 }
   0x3   :  { %p164_p1 = scmp.lt.u32.totalorder %s160_s16, %s265_s0 }
   0x5   :  { %p166_p2 = pnand %p164_p1, %p161_p0 }
   0x7   :  { %169 = shalt.err (!%p166_p2)
}
   0x8   :  { %s170_s21 = scalar_lea.vmem %s16_s13, 256  ;;  %p175_p4 = scmp.lt.s32.totalorder %s16_s13, %s16_s13 }
   0x9   :  { %p171_p3 = scmp.ne.s32.totalorder %s16_s13, %s170_s21  ;;  %p176_p5 = scmp.lt.s32.totalorder %s170_s21, %s170_s21 }
   0xb   :  { %p177_p6 = por %p176_p5, %p175_p4 }
   0xd   :  { %p178_p7 = pnand %p177_p6, %p171_p3 }
   0xf   :  { %181 = shalt.err (!%p178_p7)
}
  0x10   :  { %s209_s22 = smov 128   ;;  %s210_s23 = smov 8  }
  0x11   :  { %21 = dma.hbm_to_vmem [thread:$0]  %s265_s0, 256, %s16_s13, [#allocation3], %s209_s22, %s209_s22, %s210_s23  }
  0x12   :  { %s211_s26 = smov [#allocation4]   ;;  %s182_s30 = scalar_lea.hbm %s266_s1, 64 }
  0x13   :  { %s28_s27 = sshll.u32 %s211_s26, 4  ;;  %p183_p8 = scmp.ne.s32.totalorder %s266_s1, %s182_s30  ;;  %s29_s27 = int_to_ptr.vmem [resolvable:$true] %s28_s27 }
  0x14   :  { %p186_p9 = scmp.lt.u32.totalorder %s182_s30, %s266_s1 }
  0x16   :  { %p188_p10 = pnand %p186_p9, %p183_p8 }
  0x18   :  { %191 = shalt.err (!%p188_p10)
}
  0x19   :  { %s192_s8 = scalar_lea.vmem %s29_s27, 64  ;;  %p197_p12 = scmp.lt.s32.totalorder %s29_s27, %s29_s27 }
  0x1a   :  { %p193_p11 = scmp.ne.s32.totalorder %s29_s27, %s192_s8  ;;  %p198_p13 = scmp.lt.s32.totalorder %s192_s8, %s192_s8 }
  0x1c   :  { %p199_p0 = por %p198_p13, %p197_p12 }
  0x1e   :  { %p200_p1 = pnand %p199_p0, %p193_p11 }
  0x20   :  { %203 = shalt.err (!%p200_p1)
}
  0x21   :  { %31 = dma.hbm_to_vmem [thread:$0]  %s266_s1, 64, %s29_s27, [#allocation5]  }
  0x22   :  { %204 = dma.done.wait [#allocation3], 256  }
  0x23   :  { %205 = vsyncadd [#allocation3], 4294967040 }
  0x24   :  { %206 = dma.done.wait [#allocation5], 64  }
  0x25   :  { %207 = vsyncadd [#allocation5], 4294967232  ;;  %vm50_vm0 = vcmask 261120   ;;  %v42_v0 = vld [vmem:[#allocation4] sm:$0xf]  ;;  %v40_v1 = vld [vmem:[#allocation2] sm:$0xff] }
  0x26   :  { %151 = vmatprep.subr.msk.mxu0 %vm50_vm0, %v42_v0  ;;  %153 = vmatprep.mubr.msk.f32.mxu0 %vm50_vm0, %v40_v1  ;;  %v41_v2 = vld [vmem:[#allocation2 + $0x8] sm:$0xff]  ;;  %v144_v3 = vld [vmem:[%s267_s2] ss:$0 sm:$0xff]  ;;  %vm135_vm1 = vcmask 31744  }
  0x27   :  { %152 = vmatpush3.xpose.msk.msra.mxu0 %vm50_vm0, %v42_v0 }
  0x2a   :  { %154 = vmatmul.mubr.msk.f32.vlgmr.msra.gmra.mrb[0].mxu0 %vm50_vm0, %v41_v2 }
  0xfd   :  { %v155_v4 = vpop.f32.mrb[0].mxu0 }
  0xfe   :  { %v132_v5 = vadd.f32 %v155_v4, %v144_v3  ;;  %v126_v6 = vpop.f32.mrb[1].mxu0 }
  0xff   :  { %v127_v7 = vadd.f32 %v144_v3, %v126_v6 }
 0x100   :  { %137 = vst.msk [vmem:[%s268_s3 + $0x8] sm:$0xff] %vm135_vm1, %v132_v5 }
 0x101   :  { %136 = vst.msk [vmem:[%s268_s3] sm:$0xff] %vm135_vm1, %v127_v7 }
 0x102   :  { %142 = vsyncpa [#allocation3], 1 }
 0x103   :  { %143 = vsyncpa [#allocation5], 1 }

</bundles_post_ra>
